<compile_context>
chip_gen: v5e
topology: v5e:2x2
jax: 0.10.0
libtpu: 0.0.40
codegen_flags: <defaults>
</compile_context>

<pallas_src>
import functools

import jax
import jax.numpy as jnp
from jax.experimental import pallas as pl
from jax.experimental.pallas import tpu as pltpu


def _round_up(x, m):
    return ((x + m - 1) // m) * m


def trunknet_kernel(x_ref, *refs, compute_dtype):
    """One batch tile of the 5-layer tanh MLP.

    x_ref: (in_dim, tn) feature-major input tile.
    refs:  (w0, b0, w1, b1, ..., w4, b4, o_ref) with w_i in PyTorch
           (out_features, in_features) layout and b_i as (out_features, 1).
    o_ref: (tn, out_dim) row-major output tile.
    """
    o_ref = refs[-1]
    params = refs[:-1]

    x = x_ref[...]                                       # (in_dim, tn) f32
    in_dim = x.shape[0]

    # Layer 0: contraction K = in_dim is tiny (2) -> VPU broadcast MACs, no
    # MXU push/pop on the serial critical path.
    w0_ref, b0_ref = params[0], params[1]
    pre = b0_ref[...] + w0_ref[:, 0:1] * x[0:1, :]       # (width, tn)
    for k in range(1, in_dim):
        pre = pre + w0_ref[:, k:k + 1] * x[k:k + 1, :]
    h = jnp.tanh(pre.astype(compute_dtype))

    # Remaining layers: MXU matmuls with f32 accumulation; tanh after every
    # layer (the module applies self.out = Tanh() after the last Linear too).
    n_layers = len(params) // 2
    for li in range(1, n_layers):
        w_ref, b_ref = params[2 * li], params[2 * li + 1]
        pre = jnp.dot(w_ref[...], h.astype(jnp.float32),
                      preferred_element_type=jnp.float32) + b_ref[...]
        h = jnp.tanh(pre.astype(compute_dtype))

    # (out_dim, tn) -> (tn, out_dim): one small per-tile XLU transpose so the
    # HBM output is already row-major (kills the wrapper-side transpose pass).
    o_ref[...] = jnp.transpose(h.astype(o_ref.dtype))


@functools.partial(jax.jit, static_argnames=("tn", "use_bf16_tanh"))
def trunknet_forward(x, params, *, tn=2048, use_bf16_tanh=False):
    """x: (N, in_dim) float32 -> (N, out_dim), matching TrunkNet.forward.

    params: list of (W, b) per layer, W (out_features, in_features) (PyTorch
    nn.Linear layout), b (out_features, 1).
    tn: target batch tile (sweep 1024-4096 on v6e/v7x; keep <=2048 on v5e).
    use_bf16_tanh: bf16 EUP tanh path (v6e/v7x only; breaks 1e-5 parity).
    """
    N, in_dim = x.shape
    out_dim = params[-1][0].shape[0]
    if N == 0:                                           # degenerate-batch guard
        return jnp.zeros((0, out_dim), x.dtype)

    lane = 128
    n_lane = _round_up(N, lane)
    # Balanced tiles (ragged N can't waste up to a whole tile of padding) and
    # >=2 grid steps when the batch allows, so v7x's two TensorCores both get
    # work under dimension_semantics=("parallel",).  On 1-TC chips the extra
    # step costs ~0.35us -- negligible.
    want_tiles = max(pl.cdiv(n_lane, tn), 2 if n_lane >= 2 * lane else 1)
    tn_eff = _round_up(pl.cdiv(n_lane, want_tiles), lane)
    num_tiles = pl.cdiv(n_lane, tn_eff)
    n_pad = num_tiles * tn_eff

    # Batch onto the lane axis.  This transpose/pad touches only in_dim (=2)
    # floats per row; the expensive out_dim-wide transpose is done per tile
    # inside the kernel instead.
    xt = x.T                                             # (in_dim, N)
    if n_pad != N:
        xt = jnp.pad(xt, ((0, 0), (0, n_pad - N)))

    flat = []
    weight_specs = []
    for w, b in params:
        flat.extend([w, b])
        # Grid-invariant full-array blocks: constant index_map -> DMA'd once
        # and resident in VMEM for every grid step (~5 KB total footprint).
        weight_specs.append(pl.BlockSpec(w.shape, lambda i: (0, 0)))
        weight_specs.append(pl.BlockSpec(b.shape, lambda i: (0, 0)))

    compute_dtype = jnp.bfloat16 if use_bf16_tanh else jnp.float32
    out = pl.pallas_call(
        functools.partial(trunknet_kernel, compute_dtype=compute_dtype),
        out_shape=jax.ShapeDtypeStruct((n_pad, out_dim), x.dtype),
        grid_spec=pltpu.PrefetchScalarGridSpec(
            num_scalar_prefetch=0,
            grid=(num_tiles,),
            in_specs=[pl.BlockSpec((in_dim, tn_eff), lambda i: (0, i))]
                     + weight_specs,
            out_specs=pl.BlockSpec((tn_eff, out_dim), lambda i: (i, 0)),
        ),
        compiler_params=pltpu.CompilerParams(
            dimension_semantics=("parallel",)),
    )(xt, *flat)

    # Padded garbage rows were computed on zero columns and are sliced off.
    return out if n_pad == N else out[:N]


def init_trunknet_params(key, in_dim, out_dim, width=32):
    """Deterministic init mirroring TrunkNet.__init__ (PyTorch default Linear init).

    Weights kept in PyTorch-native (out_features, in_features) layout,
    biases as (out_features, 1).
    """
    dims = [(in_dim, width), (width, width), (width, width),
            (width, width), (width, out_dim)]
    params = []
    for (fan_in, fan_out) in dims:
        key, kw, kb = jax.random.split(key, 3)
        bound = 1.0 / jnp.sqrt(fan_in)
        w = jax.random.uniform(kw, (fan_out, fan_in), jnp.float32, -bound, bound)
        b = jax.random.uniform(kb, (fan_out, 1), jnp.float32, -bound, bound)
        params.append((w, b))
    return params


def trunknet_reference(x, params):
    """Pure-JAX reference with the same math as the PyTorch module."""
    h = x
    for i, (w, b) in enumerate(params):
        h = h @ w.T + b[:, 0]
        if i < len(params) - 1:
            h = jnp.tanh(h)
    return jnp.tanh(h)


if __name__ == "__main__":
    key = jax.random.PRNGKey(0)
    in_dim, out_dim, width = 2, 16, 32          # spatial coord dim d, output p, width

    key, kp = jax.random.split(key)
    params = init_trunknet_params(kp, in_dim, out_dim, width)

    # Case 1: lane-aligned batch (forces the >=2-step grid path, no padding).
    key, kx1 = jax.random.split(key)
    x1 = jax.random.normal(kx1, (256, in_dim), jnp.float32)
    out1 = jax.block_until_ready(trunknet_forward(x1, params))
    ref1 = trunknet_reference(x1, params)
    assert out1.shape == (256, out_dim)
    assert jnp.allclose(out1, ref1, atol=1e-5, rtol=1e-5)

    # Case 2: ragged batch (exercises padding + balanced tiles + final slice).
    key, kx2 = jax.random.split(key)
    x2 = jax.random.normal(kx2, (1000, in_dim), jnp.float32)
    out2 = jax.block_until_ready(trunknet_forward(x2, params, tn=2048))
    ref2 = trunknet_reference(x2, params)
    assert out2.shape == (1000, out_dim)
    assert jnp.allclose(out2, ref2, atol=1e-5, rtol=1e-5)

    print("KERNEL_OK")
</pallas_src>

<mosaic_0001>
module attributes {stable_mosaic.version = 11 : i64} {
  func.func @trunknet_kernel(%arg0: i32, %arg1: memref<2x128xf32, #tpu.memory_space<vmem>>, %arg2: memref<32x2xf32, #tpu.memory_space<vmem>>, %arg3: memref<32x1xf32, #tpu.memory_space<vmem>>, %arg4: memref<32x32xf32, #tpu.memory_space<vmem>>, %arg5: memref<32x1xf32, #tpu.memory_space<vmem>>, %arg6: memref<32x32xf32, #tpu.memory_space<vmem>>, %arg7: memref<32x1xf32, #tpu.memory_space<vmem>>, %arg8: memref<32x32xf32, #tpu.memory_space<vmem>>, %arg9: memref<32x1xf32, #tpu.memory_space<vmem>>, %arg10: memref<16x32xf32, #tpu.memory_space<vmem>>, %arg11: memref<16x1xf32, #tpu.memory_space<vmem>>, %arg12: memref<128x16xf32, #tpu.memory_space<vmem>>) attributes {dimension_semantics = [#tpu.dimension_semantics<parallel>], iteration_bounds = array<i64: 2>, scalar_prefetch = 0 : i64, scratch_operands = 0 : i64, tpu.core_type = #tpu.core_type<tc>, window_params = [{transform_indices = @transform_0, window_bounds = array<i64: 2, 128>}, {pipeline_mode = #tpu.pipeline_mode<synchronous>, transform_indices = @transform_1, window_bounds = array<i64: 32, 2>}, {pipeline_mode = #tpu.pipeline_mode<synchronous>, transform_indices = @transform_2, window_bounds = array<i64: 32, 1>}, {pipeline_mode = #tpu.pipeline_mode<synchronous>, transform_indices = @transform_3, window_bounds = array<i64: 32, 32>}, {pipeline_mode = #tpu.pipeline_mode<synchronous>, transform_indices = @transform_4, window_bounds = array<i64: 32, 1>}, {pipeline_mode = #tpu.pipeline_mode<synchronous>, transform_indices = @transform_5, window_bounds = array<i64: 32, 32>}, {pipeline_mode = #tpu.pipeline_mode<synchronous>, transform_indices = @transform_6, window_bounds = array<i64: 32, 1>}, {pipeline_mode = #tpu.pipeline_mode<synchronous>, transform_indices = @transform_7, window_bounds = array<i64: 32, 32>}, {pipeline_mode = #tpu.pipeline_mode<synchronous>, transform_indices = @transform_8, window_bounds = array<i64: 32, 1>}, {pipeline_mode = #tpu.pipeline_mode<synchronous>, transform_indices = @transform_9, window_bounds = array<i64: 16, 32>}, {pipeline_mode = #tpu.pipeline_mode<synchronous>, transform_indices = @transform_10, window_bounds = array<i64: 16, 1>}, {transform_indices = @transform_11, window_bounds = array<i64: 128, 16>}]} {
    %c0 = arith.constant 0 : index
    %c0_0 = arith.constant 0 : index
    %0 = vector.load %arg1[%c0, %c0_0] : memref<2x128xf32, #tpu.memory_space<vmem>>, vector<2x128xf32>
    %c0_1 = arith.constant 0 : index
    %c0_2 = arith.constant 0 : index
    %1 = vector.load %arg3[%c0_1, %c0_2] : memref<32x1xf32, #tpu.memory_space<vmem>>, vector<32x1xf32>
    %c0_3 = arith.constant 0 : index
    %c0_4 = arith.constant 0 : index
    %2 = vector.load %arg2[%c0_3, %c0_4] : memref<32x2xf32, #tpu.memory_space<vmem>>, vector<32x1xf32>
    %3 = vector.extract_strided_slice %0 {offsets = [0, 0], sizes = [1, 128], strides = [1, 1]} : vector<2x128xf32> to vector<1x128xf32>
    %4 = vector.broadcast %2 : vector<32x1xf32> to vector<32x128xf32>
    %5 = vector.broadcast %3 : vector<1x128xf32> to vector<32x128xf32>
    %6 = arith.mulf %4, %5 : vector<32x128xf32>
    %7 = vector.broadcast %1 : vector<32x1xf32> to vector<32x128xf32>
    %8 = arith.addf %7, %6 : vector<32x128xf32>
    %c0_5 = arith.constant 0 : index
    %c1 = arith.constant 1 : index
    %9 = vector.load %arg2[%c0_5, %c1] : memref<32x2xf32, #tpu.memory_space<vmem>>, vector<32x1xf32>
    %10 = vector.extract_strided_slice %0 {offsets = [1, 0], sizes = [1, 128], strides = [1, 1]} : vector<2x128xf32> to vector<1x128xf32>
    %11 = vector.broadcast %9 : vector<32x1xf32> to vector<32x128xf32>
    %12 = vector.broadcast %10 : vector<1x128xf32> to vector<32x128xf32>
    %13 = arith.mulf %11, %12 : vector<32x128xf32>
    %14 = arith.addf %8, %13 : vector<32x128xf32>
    %15 = math.tanh %14 : vector<32x128xf32>
    %c0_6 = arith.constant 0 : index
    %c0_7 = arith.constant 0 : index
    %16 = vector.load %arg4[%c0_6, %c0_7] : memref<32x32xf32, #tpu.memory_space<vmem>>, vector<32x32xf32>
    %cst = arith.constant dense<0.000000e+00> : vector<32x128xf32>
    %17 = tpu.matmul %16, %15, %cst {dimension_numbers = #tpu.dot_dimension_numbers<[1], [0], [0], [1], [0, 0, 1, 1], [], []>} : vector<32x32xf32>, vector<32x128xf32>, vector<32x128xf32> -> vector<32x128xf32>
    %c0_8 = arith.constant 0 : index
    %c0_9 = arith.constant 0 : index
    %18 = vector.load %arg5[%c0_8, %c0_9] : memref<32x1xf32, #tpu.memory_space<vmem>>, vector<32x1xf32>
    %19 = vector.broadcast %18 : vector<32x1xf32> to vector<32x128xf32>
    %20 = arith.addf %17, %19 : vector<32x128xf32>
    %21 = math.tanh %20 : vector<32x128xf32>
    %c0_10 = arith.constant 0 : index
    %c0_11 = arith.constant 0 : index
    %22 = vector.load %arg6[%c0_10, %c0_11] : memref<32x32xf32, #tpu.memory_space<vmem>>, vector<32x32xf32>
    %cst_12 = arith.constant dense<0.000000e+00> : vector<32x128xf32>
    %23 = tpu.matmul %22, %21, %cst_12 {dimension_numbers = #tpu.dot_dimension_numbers<[1], [0], [0], [1], [0, 0, 1, 1], [], []>} : vector<32x32xf32>, vector<32x128xf32>, vector<32x128xf32> -> vector<32x128xf32>
    %c0_13 = arith.constant 0 : index
    %c0_14 = arith.constant 0 : index
    %24 = vector.load %arg7[%c0_13, %c0_14] : memref<32x1xf32, #tpu.memory_space<vmem>>, vector<32x1xf32>
    %25 = vector.broadcast %24 : vector<32x1xf32> to vector<32x128xf32>
    %26 = arith.addf %23, %25 : vector<32x128xf32>
    %27 = math.tanh %26 : vector<32x128xf32>
    %c0_15 = arith.constant 0 : index
    %c0_16 = arith.constant 0 : index
    %28 = vector.load %arg8[%c0_15, %c0_16] : memref<32x32xf32, #tpu.memory_space<vmem>>, vector<32x32xf32>
    %cst_17 = arith.constant dense<0.000000e+00> : vector<32x128xf32>
    %29 = tpu.matmul %28, %27, %cst_17 {dimension_numbers = #tpu.dot_dimension_numbers<[1], [0], [0], [1], [0, 0, 1, 1], [], []>} : vector<32x32xf32>, vector<32x128xf32>, vector<32x128xf32> -> vector<32x128xf32>
    %c0_18 = arith.constant 0 : index
    %c0_19 = arith.constant 0 : index
    %30 = vector.load %arg9[%c0_18, %c0_19] : memref<32x1xf32, #tpu.memory_space<vmem>>, vector<32x1xf32>
    %31 = vector.broadcast %30 : vector<32x1xf32> to vector<32x128xf32>
    %32 = arith.addf %29, %31 : vector<32x128xf32>
    %33 = math.tanh %32 : vector<32x128xf32>
    %c0_20 = arith.constant 0 : index
    %c0_21 = arith.constant 0 : index
    %34 = vector.load %arg10[%c0_20, %c0_21] : memref<16x32xf32, #tpu.memory_space<vmem>>, vector<16x32xf32>
    %cst_22 = arith.constant dense<0.000000e+00> : vector<16x128xf32>
    %35 = tpu.matmul %34, %33, %cst_22 {dimension_numbers = #tpu.dot_dimension_numbers<[1], [0], [0], [1], [0, 0, 1, 1], [], []>} : vector<16x32xf32>, vector<32x128xf32>, vector<16x128xf32> -> vector<16x128xf32>
    %c0_23 = arith.constant 0 : index
    %c0_24 = arith.constant 0 : index
    %36 = vector.load %arg11[%c0_23, %c0_24] : memref<16x1xf32, #tpu.memory_space<vmem>>, vector<16x1xf32>
    %37 = vector.broadcast %36 : vector<16x1xf32> to vector<16x128xf32>
    %38 = arith.addf %35, %37 : vector<16x128xf32>
    %39 = math.tanh %38 : vector<16x128xf32>
    %40 = tpu.transpose %39, [1, 0] : vector<16x128xf32> -> vector<128x16xf32>
    %c0_25 = arith.constant 0 : index
    %c0_26 = arith.constant 0 : index
    %41 = vector.load %arg12[%c0_25, %c0_26] : memref<128x16xf32, #tpu.memory_space<vmem>>, vector<128x16xf32>
    tpu.vector_store %arg12[%c0_25, %c0_26], %40 {strides = array<i32>} : memref<128x16xf32, #tpu.memory_space<vmem>>, vector<128x16xf32>,
    return
  }
  func.func @transform_0(%arg0: i32) -> (i32, i32) {
    %c0_i32 = arith.constant 0 : i32
    %c0_i32_0 = arith.constant 0 : i32
    return %c0_i32, %arg0 : i32, i32
  }
  func.func @transform_1(%arg0: i32) -> (i32, i32) {
    %c0_i32 = arith.constant 0 : i32
    %c0_i32_0 = arith.constant 0 : i32
    %c0_i32_1 = arith.constant 0 : i32
    return %c0_i32, %c0_i32_0 : i32, i32
  }
  func.func @transform_2(%arg0: i32) -> (i32, i32) {
    %c0_i32 = arith.constant 0 : i32
    %c0_i32_0 = arith.constant 0 : i32
    %c0_i32_1 = arith.constant 0 : i32
    return %c0_i32, %c0_i32_0 : i32, i32
  }
  func.func @transform_3(%arg0: i32) -> (i32, i32) {
    %c0_i32 = arith.constant 0 : i32
    %c0_i32_0 = arith.constant 0 : i32
    %c0_i32_1 = arith.constant 0 : i32
    return %c0_i32, %c0_i32_0 : i32, i32
  }
  func.func @transform_4(%arg0: i32) -> (i32, i32) {
    %c0_i32 = arith.constant 0 : i32
    %c0_i32_0 = arith.constant 0 : i32
    %c0_i32_1 = arith.constant 0 : i32
    return %c0_i32, %c0_i32_0 : i32, i32
  }
  func.func @transform_5(%arg0: i32) -> (i32, i32) {
    %c0_i32 = arith.constant 0 : i32
    %c0_i32_0 = arith.constant 0 : i32
    %c0_i32_1 = arith.constant 0 : i32
    return %c0_i32, %c0_i32_0 : i32, i32
  }
  func.func @transform_6(%arg0: i32) -> (i32, i32) {
    %c0_i32 = arith.constant 0 : i32
    %c0_i32_0 = arith.constant 0 : i32
    %c0_i32_1 = arith.constant 0 : i32
    return %c0_i32, %c0_i32_0 : i32, i32
  }
  func.func @transform_7(%arg0: i32) -> (i32, i32) {
    %c0_i32 = arith.constant 0 : i32
    %c0_i32_0 = arith.constant 0 : i32
    %c0_i32_1 = arith.constant 0 : i32
    return %c0_i32, %c0_i32_0 : i32, i32
  }
  func.func @transform_8(%arg0: i32) -> (i32, i32) {
    %c0_i32 = arith.constant 0 : i32
    %c0_i32_0 = arith.constant 0 : i32
    %c0_i32_1 = arith.constant 0 : i32
    return %c0_i32, %c0_i32_0 : i32, i32
  }
  func.func @transform_9(%arg0: i32) -> (i32, i32) {
    %c0_i32 = arith.constant 0 : i32
    %c0_i32_0 = arith.constant 0 : i32
    %c0_i32_1 = arith.constant 0 : i32
    return %c0_i32, %c0_i32_0 : i32, i32
  }
  func.func @transform_10(%arg0: i32) -> (i32, i32) {
    %c0_i32 = arith.constant 0 : i32
    %c0_i32_0 = arith.constant 0 : i32
    %c0_i32_1 = arith.constant 0 : i32
    return %c0_i32, %c0_i32_0 : i32, i32
  }
  func.func @transform_11(%arg0: i32) -> (i32, i32) {
    %c0_i32 = arith.constant 0 : i32
    %c0_i32_0 = arith.constant 0 : i32
    return %arg0, %c0_i32 : i32, i32
  }
}

</mosaic_0001>

<bundles_post_ra>
// kernel: trunknet_forward.1
= control target key start
LH: loop header
LB: loop body
LE: loop exit
PB: predicated region body
PF: predicated region fallthrough
CT: control target
= control target key end

     0   :  { %s992_s17 = smov 0   ;;  %s1170_s0 = inlined_call_operand.vmem [shape: f32[2,256], index: 0, kind: input, shape index: {}]   ;;  %s1171_s1 = inlined_call_operand.vmem [shape: f32[32,2], index: 1, kind: input, shape index: {}]   ;;  %s1172_s2 = inlined_call_operand.vmem [shape: f32[32,1], index: 2, kind: input, shape index: {}]   ;;  %s1173_s3 = inlined_call_operand.vmem [shape: f32[32,32], index: 3, kind: input, shape index: {}]   ;;  %s1174_s4 = inlined_call_operand.vmem [shape: f32[32,1], index: 4, kind: input, shape index: {}]   ;;  %s1175_s5 = inlined_call_operand.vmem [shape: f32[32,32], index: 5, kind: input, shape index: {}]   ;;  %s1176_s6 = inlined_call_operand.vmem [shape: f32[32,1], index: 6, kind: input, shape index: {}]   ;;  %s1177_s7 = inlined_call_operand.vmem [shape: f32[32,32], index: 7, kind: input, shape index: {}]   ;;  %s1178_s8 = inlined_call_operand.vmem [shape: f32[32,1], index: 8, kind: input, shape index: {}]   ;;  %s1179_s9 = inlined_call_operand.vmem [shape: f32[16,32], index: 9, kind: input, shape index: {}]   ;;  %s1180_s10 = inlined_call_operand.vmem [shape: f32[16,1], index: 10, kind: input, shape index: {}]   ;;  %s1181_s11 = inlined_call_operand.vmem [shape: f32[256,16], index: 11, kind: output, shape index: {}]  }
   0x1 LB: > { %s998_s18 = sadd.s32 4294967295, %s928_s17   ;;  %p846_p0 = scmp.ge.s32.totalorder %s928_s17, 1  ;;  %s928_s17 = sphi %s992_s17, %s21_s17  }
   0x2   : > { %p336_p1 = scmp.lt.s32.totalorder %s928_s17, 3 }
   0x4   : > { %p337_p2 = pnand %p846_p0, %p336_p1 }
   0x5   : > { %p375_p3 = scmp.lt.s32.totalorder (!%p337_p2), %s998_s18, 1 }
   0x6   : > { %340 = sbr.rel (%p337_p2) target bundleno = 1101 (0x44d), region = 64 }
   0xb   : > { %v393_v0 = vld [vmem:[%s1171_s1 + $0x18] sm:$0xff]  ;;  %v391_v1 = vld [vmem:[%s1171_s1 + $0x8] sm:$0xff]  ;;  %v930_v3 = vmov 0   ;;  %v388_v4 = vld [vmem:[%s1172_s2 + $0x10] sm:$0xff]  ;;  %v931_v6 = vmov 1   ;;  %s376_s28 = scalar_select %p375_p3, %s998_s18, 1 }
   0xc   : > { %v389_v2 = vld [vmem:[%s1172_s2 + $0x18] sm:$0xff]  ;;  %880 = vset.pattern.permute.xlu2 %v930_v3  ;;  %878 = vset.pattern.permute.xlu1 %v930_v3  ;;  %v392_v5 = vld [vmem:[%s1171_s1 + $0x10] sm:$0xff]  ;;  %v387_v7 = vld [vmem:[%s1172_s2 + $0x8] sm:$0xff]  ;;  %vm500_vm0 = vcmask 261120   ;;  %vm769_vm1 = vcmask 130048  }
   0xd   : > { %877 = vset.pattern.permute.xlu0 %v930_v3  ;;  %401 = vperm.xlu2 %880, %v391_v1   ;;  %v390_v8 = vld [vmem:[%s1171_s1] sm:$0xff]  ;;  %v478_v10 = vld [vmem:[%s1174_s4 + $0x10] sm:$0xff]  ;;  %v553_v11 = vld [vmem:[%s1176_s6 + $0x18] sm:$0xff]  ;;  %s847_s29 = sshll.u32 %s376_s28, 1  ;;  %s848_s28 = sshll.u32 %s998_s18, 4 }
   0xe   : > { %411 = vperm.xlu0 %877, %v393_v0   ;;  %436 = vperm.xlu1 %878, %v389_v2   ;;  %v386_v9 = vld [vmem:[%s1172_s2] sm:$0xff]  ;;  %v551_v12 = vld [vmem:[%s1176_s6 + $0x8] sm:$0xff]  ;;  %v625_v13 = vld [vmem:[%s1178_s8 + $0x10] sm:$0xff]  ;;  %s378_s13 = scalar_lea.vmem %s1170_s0, %s847_s29  ;;  %p380_p4 = scmp.lt.s32.totalorder %s848_s28, 31 }
   0xf   : > { %v694_v14 = vld [vmem:[%s1180_s10] sm:$0xff]  ;;  %v479_v27 = vld [vmem:[%s1174_s4 + $0x18] sm:$0xff]  ;;  %v477_v36 = vld [vmem:[%s1174_s4 + $0x8] sm:$0xff] }
  0x10   : > { %v385_v16 = vld [vmem:[%s378_s13] sm:$0x3]  ;;  %v552_v43 = vld [vmem:[%s1176_s6 + $0x10] sm:$0xff]  ;;  %v626_v53 = vld [vmem:[%s1178_s8 + $0x18] sm:$0xff]  ;;  %s1183_s28 = smov (!%p380_p4, %s848_s28), 31 }
  0x11   : > { %v414_v19 = vperm.slane %v385_v16, 0  ;;  %v459_v21 = vperm.slane %v385_v16, 1  ;;  %v476_v35 = vld [vmem:[%s1174_s4] sm:$0xff]  ;;  %v624_v54 = vld [vmem:[%s1178_s8 + $0x8] sm:$0xff]  ;;  %v474_v61 = vld [vmem:[%s1173_s3 + $0x10] sm:$0xff]  ;;  %s849_s29 = sshll.u32 %s1183_s28, 3 }
  0x12   : > { %v550_v44 = vld [vmem:[%s1176_s6] sm:$0xff]  ;;  %v695_v59 = vld [vmem:[%s1180_s10 + $0x8] sm:$0xff]  ;;  %v475_v62 = vld [vmem:[%s1173_s3 + $0x18] sm:$0xff]  ;;  %s1133_s13 = scalar_lea.vmem %s1181_s11, %s849_s29 }
  0x13   : > { %v472_v56 = vld [vmem:[%s1173_s3] sm:$0xff]  ;;  %v473_v60 = vld [vmem:[%s1173_s3 + $0x8] sm:$0xff] }
  0x14   : > { %v623_v58 = vld [vmem:[%s1178_s8] sm:$0xff]  ;;  %v547_v16 = vld [vmem:[%s1175_s5 + $0x8] sm:$0xff] }
  0x15   : > { %431 = vperm.xlu2 %880, %v388_v4  }
  0x16   : > { %406 = vperm.xlu0 %877, %v392_v5   ;;  %879 = vset.pattern.permute.xlu1 %v931_v6 }
  0x17   : > { %456 = vperm.xlu1 %879, %v393_v0  }
  0x1d   : > { %426 = vperm.xlu2 %880, %v387_v7  }
  0x1e   : > { %881 = vset.pattern.permute.xlu0 %v931_v6 }
  0x1f   : > { %452 = vperm.xlu0 %881, %v392_v5   ;;  %882 = vset.pattern.permute.xlu1 %v930_v3 }
  0x20   : > { %396 = vperm.xlu1 %882, %v390_v8  }
  0x25   : > { %421 = vperm.xlu2 %880, %v386_v9  }
  0x27   : > { %444 = vperm.xlu0 %881, %v390_v8  }
  0x28   : > { %883 = vset.pattern.permute.xlu1 %v931_v6 }
  0x29   : > { %448 = vperm.xlu1 %883, %v391_v1  }
  0x2d   : > { %492 = vperm.xlu2 %880, %v478_v10  }
  0x2f   : > { %885 = vset.pattern.permute.xlu0 %v930_v3 }
  0x30   : > { %487 = vperm.xlu0 %885, %v477_v36   ;;  %v620_v36 = vld [vmem:[%s1177_s7 + $0x8] sm:$0xff] }
  0x31   : > { %884 = vset.pattern.permute.xlu1 %v930_v3 }
  0x32   : > { %497 = vperm.xlu1 %884, %v479_v27  }
  0x35   : > { %571 = vperm.xlu2 %880, %v553_v11  }
  0x38   : > { %556 = vperm.xlu0 %885, %v550_v44  }
  0x3a   : > { %482 = vperm.xlu1 %884, %v476_v35  }
  0x3d   : > { %561 = vperm.xlu2 %880, %v551_v12  }
  0x40   : > { %634 = vperm.xlu0 %885, %v624_v54   ;;  %v692_v54 = vld [vmem:[%s1179_s9] sm:$0xff] }
  0x42   : > { %566 = vperm.xlu1 %884, %v552_v43  }
  0x45   : > { %639 = vperm.xlu2 %880, %v625_v13  }
  0x48   : > { %703 = vperm.xlu0 %885, %v695_v59  }
  0x4a   : > { %644 = vperm.xlu1 %884, %v626_v53  }
  0x4d   : > { %698 = vperm.xlu2 %880, %v694_v14   ;;  %v546_v14 = vld [vmem:[%s1175_s5] sm:$0xff] }
  0x52   : > { %629 = vperm.xlu1 %884, %v623_v58  }
  0x67   : > { %v402_v15 = vpop.permute.xlu2 %401 }
  0x68   : > { %v416_v39 = vmul.f32 %v414_v19, %v402_v15 }
  0x6f   : > { %v432_v22 = vpop.permute.xlu2 %431 }
  0x77   : > { %v427_v30 = vpop.permute.xlu2 %426 }
  0x78   : > { %v440_v48 = vadd.f32 %v427_v30, %v416_v39 }
  0x7f   : > { %v422_v45 = vpop.permute.xlu2 %421 }
  0x80   : > { %v412_v17 = vpop.permute.xlu0 %411  ;;  %v437_v18 = vpop.permute.xlu1 %436 }
  0x81   : > { %v418_v20 = vmul.f32 %v414_v19, %v412_v17  ;;  %v548_v17 = vld [vmem:[%s1175_s5 + $0x10] sm:$0xff] }
  0x83   : > { %v442_v25 = vadd.f32 %v437_v18, %v418_v20  ;;  %v549_v18 = vld [vmem:[%s1175_s5 + $0x18] sm:$0xff] }
  0x87   : > { %v493_v3 = vpop.permute.xlu2 %492 }
  0x88   : > { %v407_v23 = vpop.permute.xlu0 %406 }
  0x89   : > { %v457_v24 = vpop.permute.xlu1 %456  ;;  %v417_v29 = vmul.f32 %v414_v19, %v407_v23 }
  0x8a   : > { %v463_v26 = vmul.f32 %v459_v21, %v457_v24 }
  0x8b   : > { %v441_v32 = vadd.f32 %v432_v22, %v417_v29 }
  0x8c   : > { %v467_v28 = vadd.f32 %v463_v26, %v442_v25 }
  0x8e   : > { %886 = vtanh.f32 %v467_v28 }
  0x91   : > { %v453_v31 = vpop.permute.xlu0 %452 }
  0x92   : > { %v462_v33 = vmul.f32 %v459_v21, %v453_v31  ;;  %v397_v34 = vpop.permute.xlu1 %396 }
  0x93   : > { %v415_v40 = vmul.f32 %v414_v19, %v397_v34  ;;  %v619_v34 = vld [vmem:[%s1177_s7] sm:$0xff] }
  0x94   : > { %v887_v37 = vpop.eup %886  ;;  %v466_v38 = vadd.f32 %v462_v33, %v441_v32 }
  0x95   : > { %525 = vmatpush.msra.mxu0 %v887_v37  ;;  %v439_v49 = vadd.f32 %v422_v45, %v415_v40  ;;  %v621_v37 = vld [vmem:[%s1177_s7 + $0x10] sm:$0xff] }
  0x96   : > { %888 = vtanh.f32 %v466_v38  ;;  %v622_v38 = vld [vmem:[%s1177_s7 + $0x18] sm:$0xff] }
  0x99   : > { %v445_v41 = vpop.permute.xlu0 %444 }
  0x9a   : > { %v460_v42 = vmul.f32 %v459_v21, %v445_v41 }
  0x9b   : > { %v449_v46 = vpop.permute.xlu1 %448 }
  0x9c   : > { %v889_v47 = vpop.eup %888  ;;  %v461_v50 = vmul.f32 %v459_v21, %v449_v46  ;;  %v464_v51 = vadd.f32 %v460_v42, %v439_v49  ;;  %v572_v21 = vpop.permute.xlu2 %571 }
  0x9d   : > { %526 = vmatpush.msra.mxu0 %v889_v47 }
  0x9e   : > { %v465_v52 = vadd.f32 %v461_v50, %v440_v48 }
  0xa0   : > { %890 = vtanh.f32 %v465_v52 }
  0xa1   : > { %892 = vtanh.f32 %v464_v51 }
  0xa2   : > { %v488_v7 = vpop.permute.xlu0 %487 }
  0xa4   : > { %v498_v2 = vpop.permute.xlu1 %497  ;;  %v562_v27 = vpop.permute.xlu2 %561 }
  0xa6   : > { %v891_v55 = vpop.eup %890 }
  0xa7   : > { %527 = vmatpush.msra.mxu0 %v891_v55  ;;  %v893_v57 = vpop.eup %892 }
  0xa9   : > { %528 = vmatpush.msra.mxu0 %v893_v57 }
  0xaa   : > { %850 = vmatmul.msk.f32.vlgmr.msra.gmra.mxu0 %vm500_vm0, %v472_v56  ;;  %v557_v29 = vpop.permute.xlu0 %556  ;;  %v693_v56 = vld [vmem:[%s1179_s9 + $0x8] sm:$0xff] }
  0xac   : > { %v483_v9 = vpop.permute.xlu1 %482  ;;  %v640_v43 = vpop.permute.xlu2 %639 }
  0xb2   : > { %851 = vmatmul.msk.f32.gmra.mxu0 %vm500_vm0, %v473_v60  ;;  %v635_v47 = vpop.permute.xlu0 %634 }
  0xb4   : > { %v567_v23 = vpop.permute.xlu1 %566  ;;  %v699_v57 = vpop.permute.xlu2 %698 }
  0xba   : > { %852 = vmatmul.msk.f32.gmra.mxu0 %vm500_vm0, %v474_v61  ;;  %v704_v60 = vpop.permute.xlu0 %703 }
  0xbc   : > { %v645_v42 = vpop.permute.xlu1 %644 }
  0xc2   : > { %853 = vmatmul.msk.f32.gmra.mxu0 %vm500_vm0, %v475_v62 }
  0xc4   : > { %v630_v49 = vpop.permute.xlu1 %629 }
 0x127   : > { %v530_v63 = vpop.f32.mrf.mxu0 }
 0x128   : > { %v531_v10 = vadd.f32 %v530_v63, %v483_v9 }
 0x12f   : > { %v533_v0 = vpop.f32.mrf.mxu0 }
 0x130   : > { %v534_v8 = vadd.f32 %v533_v0, %v488_v7 }
 0x137   : > { %v536_v1 = vpop.f32.mrf.mxu0 }
 0x138   : > { %v537_v5 = vadd.f32 %v536_v1, %v493_v3 }
 0x13f   : > { %v539_v4 = vpop.f32.mrf.mxu0 }
 0x140   : > { %v540_v6 = vadd.f32 %v539_v4, %v498_v2 }
 0x142   : > { %894 = vtanh.f32 %v540_v6 }
 0x143   : > { %896 = vtanh.f32 %v537_v5 }
 0x144   : > { %898 = vtanh.f32 %v534_v8 }
 0x145   : > { %900 = vtanh.f32 %v531_v10 }
 0x148   : > { %v895_v11 = vpop.eup %894 }
 0x149   : > { %598 = vmatpush.msra.mxu1 %v895_v11  ;;  %v897_v12 = vpop.eup %896 }
 0x14a   : > { %v899_v13 = vpop.eup %898 }
 0x14b   : > { %599 = vmatpush.msra.mxu1 %v897_v12  ;;  %v901_v15 = vpop.eup %900 }
 0x14d   : > { %600 = vmatpush.msra.mxu1 %v899_v13 }
 0x14f   : > { %601 = vmatpush.msra.mxu1 %v901_v15 }
 0x150   : > { %854 = vmatmul.msk.f32.vlgmr.msra.gmra.mxu1 %vm500_vm0, %v546_v14 }
 0x158   : > { %855 = vmatmul.msk.f32.gmra.mxu1 %vm500_vm0, %v547_v16 }
 0x160   : > { %856 = vmatmul.msk.f32.gmra.mxu1 %vm500_vm0, %v548_v17 }
 0x168   : > { %857 = vmatmul.msk.f32.gmra.mxu1 %vm500_vm0, %v549_v18 }
 0x1cd   : > { %v603_v19 = vpop.f32.mrf.mxu1 }
 0x1ce   : > { %v604_v30 = vadd.f32 %v603_v19, %v557_v29 }
 0x1d5   : > { %v606_v20 = vpop.f32.mrf.mxu1 }
 0x1d6   : > { %v607_v28 = vadd.f32 %v606_v20, %v562_v27 }
 0x1dd   : > { %v609_v22 = vpop.f32.mrf.mxu1 }
 0x1de   : > { %v610_v25 = vadd.f32 %v609_v22, %v567_v23 }
 0x1e5   : > { %v612_v24 = vpop.f32.mrf.mxu1 }
 0x1e6   : > { %v613_v26 = vadd.f32 %v612_v24, %v572_v21 }
 0x1e8   : > { %902 = vtanh.f32 %v613_v26 }
 0x1e9   : > { %904 = vtanh.f32 %v610_v25 }
 0x1ea   : > { %906 = vtanh.f32 %v607_v28 }
 0x1eb   : > { %908 = vtanh.f32 %v604_v30 }
 0x1ee   : > { %v903_v31 = vpop.eup %902 }
 0x1ef   : > { %671 = vmatpush.msra.mxu2 %v903_v31  ;;  %v905_v32 = vpop.eup %904 }
 0x1f0   : > { %v907_v33 = vpop.eup %906 }
 0x1f1   : > { %672 = vmatpush.msra.mxu2 %v905_v32  ;;  %v909_v35 = vpop.eup %908 }
 0x1f3   : > { %673 = vmatpush.msra.mxu2 %v907_v33 }
 0x1f5   : > { %674 = vmatpush.msra.mxu2 %v909_v35 }
 0x1f6   : > { %858 = vmatmul.msk.f32.vlgmr.msra.gmra.mxu2 %vm500_vm0, %v619_v34 }
 0x1fe   : > { %859 = vmatmul.msk.f32.gmra.mxu2 %vm500_vm0, %v620_v36 }
 0x206   : > { %860 = vmatmul.msk.f32.gmra.mxu2 %vm500_vm0, %v621_v37 }
 0x20e   : > { %861 = vmatmul.msk.f32.gmra.mxu2 %vm500_vm0, %v622_v38 }
 0x279   : > { %v676_v39 = vpop.f32.mrf.mxu2 }
 0x27a   : > { %v677_v50 = vadd.f32 %v676_v39, %v630_v49 }
 0x281   : > { %v679_v40 = vpop.f32.mrf.mxu2 }
 0x282   : > { %v680_v48 = vadd.f32 %v679_v40, %v635_v47 }
 0x289   : > { %v682_v41 = vpop.f32.mrf.mxu2 }
 0x28a   : > { %v683_v45 = vadd.f32 %v682_v41, %v640_v43 }
 0x291   : > { %v685_v44 = vpop.f32.mrf.mxu2 }
 0x292   : > { %v686_v46 = vadd.f32 %v685_v44, %v645_v42 }
 0x294   : > { %910 = vtanh.f32 %v686_v46 }
 0x295   : > { %912 = vtanh.f32 %v683_v45 }
 0x296   : > { %914 = vtanh.f32 %v680_v48 }
 0x297   : > { %916 = vtanh.f32 %v677_v50 }
 0x29a   : > { %v911_v51 = vpop.eup %910 }
 0x29b   : > { %724 = vmatpush.msra.mxu3 %v911_v51  ;;  %v913_v52 = vpop.eup %912 }
 0x29c   : > { %v915_v53 = vpop.eup %914 }
 0x29d   : > { %725 = vmatpush.msra.mxu3 %v913_v52  ;;  %v917_v55 = vpop.eup %916 }
 0x29f   : > { %726 = vmatpush.msra.mxu3 %v915_v53 }
 0x2a1   : > { %727 = vmatpush.msra.mxu3 %v917_v55 }
 0x2a2   : > { %862 = vmatmul.msk.f32.vlgmr.msra.gmra.mxu3 %vm500_vm0, %v692_v54 }
 0x2aa   : > { %863 = vmatmul.msk.f32.gmra.mxu3 %vm500_vm0, %v693_v56 }
 0x325   : > { %v729_v58 = vpop.f32.mrf.mxu3 }
 0x326   : > { %v730_v59 = vadd.f32 %v729_v58, %v699_v57 }
 0x328   : > { %918 = vtanh.f32 %v730_v59 }
 0x32d   : > { %v732_v61 = vpop.f32.mrf.mxu3 }
 0x32e   : > { %v919_v62 = vpop.eup %918  ;;  %v733_v63 = vadd.f32 %v732_v61, %v704_v60 }
 0x32f   : > { %737 = vxpose.xlu1.b32.start [1/2] (short) %v919_v62, 128 }
 0x330   : > { %920 = vtanh.f32 %v733_v63 }
 0x336   : > { %v921_v0 = vpop.eup %920 }
 0x337   : > { %738 = vxpose.xlu1.b32.end [2/2] (short) %v921_v0, 128 }
 0x3d3   : > { %v753_v1 = vpop.trf.xlu1 }
 0x3d4   : > { %770 = vst.msk [vmem:[%s1133_s13] sm:$0xff] %vm769_vm1, %v753_v1 }
 0x3db   : > { %v754_v2 = vpop.trf.xlu1 }
 0x3dc   : > { %771 = vst.msk [vmem:[%s1133_s13 + $0x8] sm:$0xff] %vm769_vm1, %v754_v2 }
 0x3e3   : > { %v755_v3 = vpop.trf.xlu1 }
 0x3e4   : > { %772 = vst.msk [vmem:[%s1133_s13 + $0x10] sm:$0xff] %vm769_vm1, %v755_v3 }
 0x3eb   : > { %v756_v4 = vpop.trf.xlu1 }
 0x3ec   : > { %773 = vst.msk [vmem:[%s1133_s13 + $0x18] sm:$0xff] %vm769_vm1, %v756_v4 }
 0x3f3   : > { %v757_v5 = vpop.trf.xlu1 }
 0x3f4   : > { %774 = vst.msk [vmem:[%s1133_s13 + $0x20] sm:$0xff] %vm769_vm1, %v757_v5 }
 0x3fb   : > { %v758_v6 = vpop.trf.xlu1 }
 0x3fc   : > { %775 = vst.msk [vmem:[%s1133_s13 + $0x28] sm:$0xff] %vm769_vm1, %v758_v6 }
 0x403   : > { %v759_v7 = vpop.trf.xlu1 }
 0x404   : > { %776 = vst.msk [vmem:[%s1133_s13 + $0x30] sm:$0xff] %vm769_vm1, %v759_v7 }
 0x40b   : > { %v760_v8 = vpop.trf.xlu1 }
 0x40c   : > { %777 = vst.msk [vmem:[%s1133_s13 + $0x38] sm:$0xff] %vm769_vm1, %v760_v8 }
 0x413   : > { %v761_v9 = vpop.trf.xlu1 }
 0x414   : > { %778 = vst.msk [vmem:[%s1133_s13 + $0x40] sm:$0xff] %vm769_vm1, %v761_v9 }
 0x41b   : > { %v762_v10 = vpop.trf.xlu1 }
 0x41c   : > { %779 = vst.msk [vmem:[%s1133_s13 + $0x48] sm:$0xff] %vm769_vm1, %v762_v10 }
 0x423   : > { %v763_v11 = vpop.trf.xlu1 }
 0x424   : > { %780 = vst.msk [vmem:[%s1133_s13 + $0x50] sm:$0xff] %vm769_vm1, %v763_v11 }
 0x42b   : > { %v764_v12 = vpop.trf.xlu1 }
 0x42c   : > { %781 = vst.msk [vmem:[%s1133_s13 + $0x58] sm:$0xff] %vm769_vm1, %v764_v12 }
 0x433   : > { %v765_v13 = vpop.trf.xlu1 }
 0x434   : > { %782 = vst.msk [vmem:[%s1133_s13 + $0x60] sm:$0xff] %vm769_vm1, %v765_v13 }
 0x43b   : > { %v766_v14 = vpop.trf.xlu1 }
 0x43c   : > { %783 = vst.msk [vmem:[%s1133_s13 + $0x68] sm:$0xff] %vm769_vm1, %v766_v14 }
 0x443   : > { %v767_v15 = vpop.trf.xlu1 }
 0x444   : > { %784 = vst.msk [vmem:[%s1133_s13 + $0x70] sm:$0xff] %vm769_vm1, %v767_v15 }
 0x44b   : > { %v768_v16 = vpop.trf.xlu1 }
 0x44c   : > { %785 = vst.msk [vmem:[%s1133_s13 + $0x78] sm:$0xff] %vm769_vm1, %v768_v16 }
 0x44d PF: > { %s21_s17 = sadd.s32 1, %s928_s17  }
 0x44e   : > { %p18_p5 = scmp.ge.s32.totalorder %s21_s17, 4  }
 0x450   :  { %20 = sbr.rel (!%p18_p5) target bundleno = 1 (0x1), region = 94 }

</bundles_post_ra>
